<compile_context>
chip_gen: v5e
topology: v5e:2x2
jax: 0.10.0
libtpu: 0.0.40
codegen_flags: <defaults>
</compile_context>

<pallas_src>
import jax
import jax.numpy as jnp
from jax.experimental import pallas as pl
from jax.experimental.pallas import tpu as pltpu


def num_channels_to_num_groups(num_channels):
    """Same rule as the ENR codebase: #groups for a GroupNorm layer."""
    if num_channels < 8:
        return 1
    if num_channels < 32:
        return 2
    if num_channels < 64:
        return 4
    if num_channels < 128:
        return 8
    if num_channels < 256:
        return 16
    return 32


def _gn_affine_lrelu_per_sample(h, gamma, beta, batch, hw, num_groups,
                                eps=1e-5, slope=0.2):
    """Per-sample GroupNorm (biased variance) + affine + LeakyReLU, fused.

    h:     (C, batch*hw) channels-first slab with the batch folded into lanes.
    gamma: (C, 1), beta: (C, 1) GroupNorm affine parameters.
    Returns the activated slab with the same shape as h.
    """
    c = h.shape[0]
    cg = c // num_groups
    gamma_g = gamma.reshape(num_groups, cg, 1)   # sublane regroup (cheap)
    beta_g = beta.reshape(num_groups, cg, 1)
    parts = []
    for b in range(batch):                       # static; batch is tiny
        hb = h[:, b * hw:(b + 1) * hw]           # (C, HW) lane slice
        hg = hb.reshape(num_groups, cg, hw)      # sublane regroup (cheap)
        m = jnp.mean(jnp.mean(hg, axis=2, keepdims=True), axis=1, keepdims=True)
        d = hg - m
        v = jnp.mean(jnp.mean(d * d, axis=2, keepdims=True), axis=1, keepdims=True)
        # Fold gamma into the rsqrt scale: saves one full-slab multiply.
        scale = gamma_g * jax.lax.rsqrt(v + eps)
        y = d * scale + beta_g
        # LeakyReLU(0.2) == max(y, 0.2*y) for slope in (0,1): one VPU max
        # instead of compare + select.
        y = jnp.maximum(y, slope * y)
        parts.append(y.reshape(c, hw))
    return jnp.concatenate(parts, axis=1)        # back to (C, batch*hw)


def _make_kernel(batch, hw, num_channels, groups, slope=0.2):
    num_layers = len(num_channels)

    def kernel(*refs):
        x_ref = refs[0]
        o_ref = refs[-1]
        x = x_ref[...]                           # (B, C_in, HW) f32
        # Fold the batch into the lane dim: (C_in, B*HW) -> 128 dense lanes.
        h = jnp.concatenate([x[b] for b in range(batch)], axis=1)
        idx = 1
        for i in range(num_layers):
            w = refs[idx][...]                   # (C_out, C_in)
            bias = refs[idx + 1][...]            # (C_out, 1)
            idx += 2
            # 1x1 conv == channels-first matmul on the MXU (N = B*HW lanes).
            # f32 operands keep the 1e-4 tolerance; bf16 only pays off for
            # much larger channel counts at these sizes.
            h = jnp.dot(w, h, preferred_element_type=jnp.float32) + bias
            if i != num_layers - 1:
                gamma = refs[idx][...]           # (C_out, 1)
                beta = refs[idx + 1][...]
                idx += 2
                h = _gn_affine_lrelu_per_sample(h, gamma, beta, batch, hw,
                                                groups[i], slope=slope)
        # Un-fold the batch: per-sample (C_last, HW) stores give the output
        # directly in PyTorch (B, C_last, HW) layout (no wrapper transpose).
        for b in range(batch):
            o_ref[b] = h[:, b * hw:(b + 1) * hw].astype(o_ref.dtype)

    return kernel


def inverse_projection_pallas(x_nchw, params, input_shape, num_channels):
    """x_nchw: (B, C, H, W) float32. Returns (B, C_last//W, W, H, W)."""
    B, Cin, H, W = x_nchw.shape
    assert (Cin, H, W) == tuple(input_shape)
    assert num_channels[-1] % W == 0
    HW = H * W
    C_last = num_channels[-1]
    num_layers = len(num_channels)
    groups = [num_channels_to_num_groups(c) for c in num_channels]
    for c, g in zip(num_channels, groups):
        assert c % g == 0, "channels must be divisible by group count"

    # Rough all-layers-resident activation footprint (f32). At these shapes it
    # is ~50 KB; everything (weights + activations) lives in VMEM in one step.
    # TODO(synk): add an HW-tiled two-pass GroupNorm path if shapes ever scale
    # towards v7x's 64 MiB VMEM.
    act_bytes = 4 * B * HW * (Cin + sum(num_channels))
    assert act_bytes < 16 * 1024 * 1024, "tile over HW for large shapes"

    # NCHW -> (B, C, HW): contiguous reshape, NO transpose.
    x = x_nchw.reshape(B, Cin, HW)

    flat_args = [x]
    for i in range(num_layers):
        flat_args += [params[i]["w"], params[i]["b"]]
        if i != num_layers - 1:
            flat_args += [params[i]["gamma"], params[i]["beta"]]

    kernel = _make_kernel(B, HW, num_channels, groups)

    # Single kernel invocation (no grid): no per-step pipeline overhead and no
    # serial batch loop. (A 2-wide "parallel" batch axis only pays off on v7x
    # when per-step work is >> a few us, which is not the case here.)
    vmem = pltpu.MemorySpace.VMEM
    out = pl.pallas_call(
        kernel,
        out_shape=jax.ShapeDtypeStruct((B, C_last, HW), jnp.float32),
        in_specs=[pl.BlockSpec(memory_space=vmem) for _ in flat_args],
        out_specs=pl.BlockSpec(memory_space=vmem),
    )(*flat_args)

    # (B, C_last, HW) is the contiguous layout of (B, C_last, H, W), so the
    # final PyTorch .view is a free reshape here too (no transpose).
    return out.reshape(B, C_last // W, W, H, W)


def inverse_projection_ref(x_nchw, params, num_channels):
    """Pure-JAX reference (mirrors the PyTorch forward) for validation."""
    B, Cin, H, W = x_nchw.shape
    HW = H * W
    num_layers = len(num_channels)
    h = x_nchw.reshape(B, Cin, HW).astype(jnp.float32)       # (B, C, HW)
    for i in range(num_layers):
        w, b = params[i]["w"], params[i]["b"]                # (O, C), (O, 1)
        h = jnp.einsum("oc,bcs->bos", w, h,
                       precision=jax.lax.Precision.HIGHEST) + b[None]
        if i != num_layers - 1:
            C = num_channels[i]
            G = num_channels_to_num_groups(C)
            cg = C // G
            hg = h.reshape(B, G, cg, HW)
            m = jnp.mean(hg, axis=(2, 3), keepdims=True)
            v = jnp.mean((hg - m) ** 2, axis=(2, 3), keepdims=True)
            hn = ((hg - m) * jax.lax.rsqrt(v + 1e-5)).reshape(B, C, HW)
            y = hn * params[i]["gamma"][None] + params[i]["beta"][None]
            h = jnp.where(y >= 0, y, 0.2 * y)
    C_last = num_channels[-1]
    return h.reshape(B, C_last // W, W, H, W)


def init_params(key, input_shape, num_channels):
    params = []
    in_c = input_shape[0]
    num_layers = len(num_channels)
    for i, out_c in enumerate(num_channels):
        key, k1, k2, k3, k4 = jax.random.split(key, 5)
        layer = {
            # Conv2d(1x1) weight stored channels-first: (out_c, in_c).
            "w": (jax.random.normal(k1, (out_c, in_c), jnp.float32)
                  * (1.0 / jnp.sqrt(in_c))),
            "b": jax.random.normal(k2, (out_c, 1), jnp.float32) * 0.1,
        }
        if i != num_layers - 1:
            layer["gamma"] = 1.0 + 0.1 * jax.random.normal(
                k3, (out_c, 1), jnp.float32)
            layer["beta"] = 0.1 * jax.random.normal(
                k4, (out_c, 1), jnp.float32)
        params.append(layer)
        in_c = out_c
    return params


if __name__ == "__main__":
    # Shapes consistent with the module: input_shape=(C,H,W)=(4,8,8),
    # num_channels=(32, 64); 64 % W(=8) == 0 -> output (B, 8, 8, 8, 8).
    input_shape = (4, 8, 8)
    num_channels = (32, 64)
    B = 2

    key = jax.random.PRNGKey(0)
    kx, kp = jax.random.split(key)
    x = jax.random.normal(kx, (B,) + input_shape, jnp.float32)
    params = init_params(kp, input_shape, num_channels)

    out = inverse_projection_pallas(x, params, input_shape, num_channels)
    out = jax.block_until_ready(out)

    ref = inverse_projection_ref(x, params, num_channels)
    assert out.shape == (B, num_channels[-1] // input_shape[2],
                         input_shape[2], input_shape[1], input_shape[2])
    assert jnp.allclose(out, ref, rtol=1e-4, atol=1e-4), (
        float(jnp.max(jnp.abs(out - ref))))

    print("KERNEL_OK")
</pallas_src>

<mosaic_0001>
module attributes {stable_mosaic.version = 11 : i64} {
  func.func @kernel(%arg0: memref<2x4x64xf32, #tpu.memory_space<vmem>>, %arg1: memref<32x4xf32, #tpu.memory_space<vmem>>, %arg2: memref<32x1xf32, #tpu.memory_space<vmem>>, %arg3: memref<32x1xf32, #tpu.memory_space<vmem>>, %arg4: memref<32x1xf32, #tpu.memory_space<vmem>>, %arg5: memref<64x32xf32, #tpu.memory_space<vmem>>, %arg6: memref<64x1xf32, #tpu.memory_space<vmem>>, %arg7: memref<2x64x64xf32, #tpu.memory_space<vmem>>) attributes {dimension_semantics = [], scalar_prefetch = 0 : i64, scratch_operands = 0 : i64, tpu.core_type = #tpu.core_type<tc>} {
    %c0 = arith.constant 0 : index
    %c0_0 = arith.constant 0 : index
    %c0_1 = arith.constant 0 : index
    %0 = vector.load %arg0[%c0, %c0_0, %c0_1] : memref<2x4x64xf32, #tpu.memory_space<vmem>>, vector<2x4x64xf32>
    %1 = vector.extract_strided_slice %0 {offsets = [0, 0, 0], sizes = [1, 4, 64], strides = [1, 1, 1]} : vector<2x4x64xf32> to vector<1x4x64xf32>
    %2 = vector.shape_cast %1 : vector<1x4x64xf32> to vector<4x64xf32>
    %3 = vector.extract_strided_slice %0 {offsets = [1, 0, 0], sizes = [1, 4, 64], strides = [1, 1, 1]} : vector<2x4x64xf32> to vector<1x4x64xf32>
    %4 = vector.shape_cast %3 : vector<1x4x64xf32> to vector<4x64xf32>
    %5 = tpu.concatenate %2, %4 in 1 : vector<4x64xf32>, vector<4x64xf32> -> vector<4x128xf32>
    %c0_2 = arith.constant 0 : index
    %c0_3 = arith.constant 0 : index
    %6 = vector.load %arg1[%c0_2, %c0_3] : memref<32x4xf32, #tpu.memory_space<vmem>>, vector<32x4xf32>
    %c0_4 = arith.constant 0 : index
    %c0_5 = arith.constant 0 : index
    %7 = vector.load %arg2[%c0_4, %c0_5] : memref<32x1xf32, #tpu.memory_space<vmem>>, vector<32x1xf32>
    %cst = arith.constant dense<0.000000e+00> : vector<32x128xf32>
    %8 = tpu.matmul %6, %5, %cst {dimension_numbers = #tpu.dot_dimension_numbers<[1], [0], [0], [1], [0, 0, 1, 1], [], []>} : vector<32x4xf32>, vector<4x128xf32>, vector<32x128xf32> -> vector<32x128xf32>
    %9 = vector.broadcast %7 : vector<32x1xf32> to vector<32x128xf32>
    %10 = arith.addf %8, %9 : vector<32x128xf32>
    %c0_6 = arith.constant 0 : index
    %c0_7 = arith.constant 0 : index
    %11 = vector.load %arg3[%c0_6, %c0_7] : memref<32x1xf32, #tpu.memory_space<vmem>>, vector<32x1xf32>
    %c0_8 = arith.constant 0 : index
    %c0_9 = arith.constant 0 : index
    %12 = vector.load %arg4[%c0_8, %c0_9] : memref<32x1xf32, #tpu.memory_space<vmem>>, vector<32x1xf32>
    %13 = vector.shape_cast %11 : vector<32x1xf32> to vector<4x8x1xf32>
    %14 = vector.shape_cast %12 : vector<32x1xf32> to vector<4x8x1xf32>
    %15 = vector.extract_strided_slice %10 {offsets = [0, 0], sizes = [32, 64], strides = [1, 1]} : vector<32x128xf32> to vector<32x64xf32>
    %16 = vector.shape_cast %15 : vector<32x64xf32> to vector<4x8x64xf32>
    %cst_10 = arith.constant dense<0.000000e+00> : vector<4x8xf32>
    %17 = vector.multi_reduction <add>, %16, %cst_10 [2] : vector<4x8x64xf32> to vector<4x8xf32>
    %18 = vector.shape_cast %17 : vector<4x8xf32> to vector<4x8x1xf32>
    %cst_11 = arith.constant 6.400000e+01 : f32
    %19 = vector.broadcast %cst_11 : f32 to vector<4x8x1xf32>
    %20 = arith.divf %18, %19 : vector<4x8x1xf32>
    %cst_12 = arith.constant dense<0.000000e+00> : vector<4x1xf32>
    %21 = vector.multi_reduction <add>, %20, %cst_12 [1] : vector<4x8x1xf32> to vector<4x1xf32>
    %22 = vector.shape_cast %21 : vector<4x1xf32> to vector<4x1x1xf32>
    %cst_13 = arith.constant 8.000000e+00 : f32
    %23 = vector.broadcast %cst_13 : f32 to vector<4x1x1xf32>
    %24 = arith.divf %22, %23 : vector<4x1x1xf32>
    %25 = vector.broadcast %24 : vector<4x1x1xf32> to vector<4x8x64xf32>
    %26 = arith.subf %16, %25 : vector<4x8x64xf32>
    %27 = arith.mulf %26, %26 : vector<4x8x64xf32>
    %cst_14 = arith.constant dense<0.000000e+00> : vector<4x8xf32>
    %28 = vector.multi_reduction <add>, %27, %cst_14 [2] : vector<4x8x64xf32> to vector<4x8xf32>
    %29 = vector.shape_cast %28 : vector<4x8xf32> to vector<4x8x1xf32>
    %cst_15 = arith.constant 6.400000e+01 : f32
    %30 = vector.broadcast %cst_15 : f32 to vector<4x8x1xf32>
    %31 = arith.divf %29, %30 : vector<4x8x1xf32>
    %cst_16 = arith.constant dense<0.000000e+00> : vector<4x1xf32>
    %32 = vector.multi_reduction <add>, %31, %cst_16 [1] : vector<4x8x1xf32> to vector<4x1xf32>
    %33 = vector.shape_cast %32 : vector<4x1xf32> to vector<4x1x1xf32>
    %cst_17 = arith.constant 8.000000e+00 : f32
    %34 = vector.broadcast %cst_17 : f32 to vector<4x1x1xf32>
    %35 = arith.divf %33, %34 : vector<4x1x1xf32>
    %cst_18 = arith.constant 9.99999974E-6 : f32
    %36 = vector.broadcast %cst_18 : f32 to vector<4x1x1xf32>
    %37 = arith.addf %35, %36 : vector<4x1x1xf32>
    %38 = math.rsqrt %37 : vector<4x1x1xf32>
    %39 = vector.broadcast %38 : vector<4x1x1xf32> to vector<4x8x1xf32>
    %40 = arith.mulf %13, %39 : vector<4x8x1xf32>
    %41 = vector.broadcast %40 : vector<4x8x1xf32> to vector<4x8x64xf32>
    %42 = arith.mulf %26, %41 : vector<4x8x64xf32>
    %43 = vector.broadcast %14 : vector<4x8x1xf32> to vector<4x8x64xf32>
    %44 = arith.addf %42, %43 : vector<4x8x64xf32>
    %cst_19 = arith.constant 2.000000e-01 : f32
    %45 = vector.broadcast %cst_19 : f32 to vector<4x8x64xf32>
    %46 = arith.mulf %45, %44 : vector<4x8x64xf32>
    %47 = arith.maximumf %44, %46 : vector<4x8x64xf32>
    %48 = vector.shape_cast %47 : vector<4x8x64xf32> to vector<32x64xf32>
    %49 = vector.extract_strided_slice %10 {offsets = [0, 64], sizes = [32, 64], strides = [1, 1]} : vector<32x128xf32> to vector<32x64xf32>
    %50 = vector.shape_cast %49 : vector<32x64xf32> to vector<4x8x64xf32>
    %cst_20 = arith.constant dense<0.000000e+00> : vector<4x8xf32>
    %51 = vector.multi_reduction <add>, %50, %cst_20 [2] : vector<4x8x64xf32> to vector<4x8xf32>
    %52 = vector.shape_cast %51 : vector<4x8xf32> to vector<4x8x1xf32>
    %cst_21 = arith.constant 6.400000e+01 : f32
    %53 = vector.broadcast %cst_21 : f32 to vector<4x8x1xf32>
    %54 = arith.divf %52, %53 : vector<4x8x1xf32>
    %cst_22 = arith.constant dense<0.000000e+00> : vector<4x1xf32>
    %55 = vector.multi_reduction <add>, %54, %cst_22 [1] : vector<4x8x1xf32> to vector<4x1xf32>
    %56 = vector.shape_cast %55 : vector<4x1xf32> to vector<4x1x1xf32>
    %cst_23 = arith.constant 8.000000e+00 : f32
    %57 = vector.broadcast %cst_23 : f32 to vector<4x1x1xf32>
    %58 = arith.divf %56, %57 : vector<4x1x1xf32>
    %59 = vector.broadcast %58 : vector<4x1x1xf32> to vector<4x8x64xf32>
    %60 = arith.subf %50, %59 : vector<4x8x64xf32>
    %61 = arith.mulf %60, %60 : vector<4x8x64xf32>
    %cst_24 = arith.constant dense<0.000000e+00> : vector<4x8xf32>
    %62 = vector.multi_reduction <add>, %61, %cst_24 [2] : vector<4x8x64xf32> to vector<4x8xf32>
    %63 = vector.shape_cast %62 : vector<4x8xf32> to vector<4x8x1xf32>
    %cst_25 = arith.constant 6.400000e+01 : f32
    %64 = vector.broadcast %cst_25 : f32 to vector<4x8x1xf32>
    %65 = arith.divf %63, %64 : vector<4x8x1xf32>
    %cst_26 = arith.constant dense<0.000000e+00> : vector<4x1xf32>
    %66 = vector.multi_reduction <add>, %65, %cst_26 [1] : vector<4x8x1xf32> to vector<4x1xf32>
    %67 = vector.shape_cast %66 : vector<4x1xf32> to vector<4x1x1xf32>
    %cst_27 = arith.constant 8.000000e+00 : f32
    %68 = vector.broadcast %cst_27 : f32 to vector<4x1x1xf32>
    %69 = arith.divf %67, %68 : vector<4x1x1xf32>
    %cst_28 = arith.constant 9.99999974E-6 : f32
    %70 = vector.broadcast %cst_28 : f32 to vector<4x1x1xf32>
    %71 = arith.addf %69, %70 : vector<4x1x1xf32>
    %72 = math.rsqrt %71 : vector<4x1x1xf32>
    %73 = vector.broadcast %72 : vector<4x1x1xf32> to vector<4x8x1xf32>
    %74 = arith.mulf %13, %73 : vector<4x8x1xf32>
    %75 = vector.broadcast %74 : vector<4x8x1xf32> to vector<4x8x64xf32>
    %76 = arith.mulf %60, %75 : vector<4x8x64xf32>
    %77 = vector.broadcast %14 : vector<4x8x1xf32> to vector<4x8x64xf32>
    %78 = arith.addf %76, %77 : vector<4x8x64xf32>
    %cst_29 = arith.constant 2.000000e-01 : f32
    %79 = vector.broadcast %cst_29 : f32 to vector<4x8x64xf32>
    %80 = arith.mulf %79, %78 : vector<4x8x64xf32>
    %81 = arith.maximumf %78, %80 : vector<4x8x64xf32>
    %82 = vector.shape_cast %81 : vector<4x8x64xf32> to vector<32x64xf32>
    %83 = tpu.concatenate %48, %82 in 1 : vector<32x64xf32>, vector<32x64xf32> -> vector<32x128xf32>
    %c0_30 = arith.constant 0 : index
    %c0_31 = arith.constant 0 : index
    %84 = vector.load %arg5[%c0_30, %c0_31] : memref<64x32xf32, #tpu.memory_space<vmem>>, vector<64x32xf32>
    %c0_32 = arith.constant 0 : index
    %c0_33 = arith.constant 0 : index
    %85 = vector.load %arg6[%c0_32, %c0_33] : memref<64x1xf32, #tpu.memory_space<vmem>>, vector<64x1xf32>
    %cst_34 = arith.constant dense<0.000000e+00> : vector<64x128xf32>
    %86 = tpu.matmul %84, %83, %cst_34 {dimension_numbers = #tpu.dot_dimension_numbers<[1], [0], [0], [1], [0, 0, 1, 1], [], []>} : vector<64x32xf32>, vector<32x128xf32>, vector<64x128xf32> -> vector<64x128xf32>
    %87 = vector.broadcast %85 : vector<64x1xf32> to vector<64x128xf32>
    %88 = arith.addf %86, %87 : vector<64x128xf32>
    %89 = vector.extract_strided_slice %88 {offsets = [0, 0], sizes = [64, 64], strides = [1, 1]} : vector<64x128xf32> to vector<64x64xf32>
    %c0_35 = arith.constant 0 : index
    %c0_36 = arith.constant 0 : index
    %c0_37 = arith.constant 0 : index
    %90 = vector.load %arg7[%c0_35, %c0_36, %c0_37] : memref<2x64x64xf32, #tpu.memory_space<vmem>>, vector<1x64x64xf32>
    %91 = vector.shape_cast %90 : vector<1x64x64xf32> to vector<64x64xf32>
    %92 = vector.shape_cast %89 : vector<64x64xf32> to vector<1x64x64xf32>
    tpu.vector_store %arg7[%c0_35, %c0_36, %c0_37], %92 {strides = array<i32>} : memref<2x64x64xf32, #tpu.memory_space<vmem>>, vector<1x64x64xf32>,
    %93 = vector.extract_strided_slice %88 {offsets = [0, 64], sizes = [64, 64], strides = [1, 1]} : vector<64x128xf32> to vector<64x64xf32>
    %c1 = arith.constant 1 : index
    %c0_38 = arith.constant 0 : index
    %c0_39 = arith.constant 0 : index
    %94 = vector.load %arg7[%c1, %c0_38, %c0_39] : memref<2x64x64xf32, #tpu.memory_space<vmem>>, vector<1x64x64xf32>
    %95 = vector.shape_cast %94 : vector<1x64x64xf32> to vector<64x64xf32>
    %96 = vector.shape_cast %93 : vector<64x64xf32> to vector<1x64x64xf32>
    tpu.vector_store %arg7[%c1, %c0_38, %c0_39], %96 {strides = array<i32>} : memref<2x64x64xf32, #tpu.memory_space<vmem>>, vector<1x64x64xf32>,
    return
  }
}

</mosaic_0001>

<bundles_post_ra>
// kernel: tpu_custom_call.1
= control target key start
LH: loop header
LB: loop body
LE: loop exit
PB: predicated region body
PF: predicated region fallthrough
CT: control target
= control target key end

     0   :  { %s1144_s0 = inlined_call_operand.vmem [shape: f32[2,4,64], index: 0, kind: input, shape index: {}]   ;;  %s1145_s1 = inlined_call_operand.vmem [shape: f32[32,4], index: 1, kind: input, shape index: {}]   ;;  %s1146_s2 = inlined_call_operand.vmem [shape: f32[32,1], index: 2, kind: input, shape index: {}]   ;;  %s1147_s3 = inlined_call_operand.vmem [shape: f32[32,1], index: 3, kind: input, shape index: {}]   ;;  %s1148_s4 = inlined_call_operand.vmem [shape: f32[32,1], index: 4, kind: input, shape index: {}]   ;;  %s1149_s5 = inlined_call_operand.vmem [shape: f32[64,32], index: 5, kind: input, shape index: {}]   ;;  %s1150_s6 = inlined_call_operand.vmem [shape: f32[64,1], index: 6, kind: input, shape index: {}]   ;;  %s1151_s7 = inlined_call_operand.hbm [shape: f32[2,64,64], index: 7, kind: output, shape index: {}]  }
   0x1   :  { %v28_v0 = vld [vmem:[%s1144_s0 + $0x4] sm:$0xf] }
   0x2   :  { %12 = vsyncpa [#allocation3], 0  ;;  %s813_s26 = smov 64   ;;  %v41_v1 = vld [vmem:[%s1146_s2 + $0x10] sm:$0xff]  ;;  %v814_v2 = vmov 0   ;;  %v40_v3 = vld [vmem:[%s1146_s2 + $0x8] sm:$0xff] }
   0x3   :  { %30 = vrot.lane.b32.xlu0 %v28_v0, %s813_s26  ;;  %765 = vset.pattern.permute.xlu1 %v814_v2  ;;  %v39_v4 = vld [vmem:[%s1146_s2] sm:$0xff]  ;;  %v42_v5 = vld [vmem:[%s1146_s2 + $0x18] sm:$0xff]  ;;  %vm33_vm0 = vcmask 523264   ;;  %vm76_vm1 = vcmask 1043456   ;;  %vm63_vm2 = vcmask 31744   ;;  %v36_v10 = vld [vmem:[%s1145_s1 + $0x8] sm:$0xff] }
   0x4   :  { %766 = vset.pattern.permute.xlu2 %v814_v2  ;;  %55 = vperm.xlu1 %765, %v41_v1   ;;  %v27_v6 = vld [vmem:[%s1144_s0] sm:$0xf]  ;;  %v37_v11 = vld [vmem:[%s1145_s1 + $0x10] sm:$0xff]  ;;  %v38_v12 = vld [vmem:[%s1145_s1 + $0x18] sm:$0xff]  ;;  %v815_v37 = vmov 64.0   ;;  %v816_v41 = vmov 8.0  }
   0x5   :  { %764 = vset.pattern.permute.xlu0 %v814_v2  ;;  %45 = vperm.xlu2 %766, %v39_v4   ;;  %v35_v8 = vld [vmem:[%s1145_s1] sm:$0xff]  ;;  %767 = vrcp.f32 %v815_v37  ;;  %s818_s18 = smov 128   ;;  %s819_s0 = smov 8  }
   0x6   :  { %769 = vrcp.f32 %v816_v41 }
   0xb   :  { %60 = vperm.xlu0 %764, %v42_v5   ;;  %v768_v38 = vpop.eup %767 }
   0xc   :  { %50 = vperm.xlu1 %765, %v40_v3   ;;  %v130_v39 = vmul.f32 64.0, %v768_v38  ;;  %v770_v43 = vpop.eup %769  ;;  %vm134_vm3 = vweird.f32 %v768_v38 }
   0xd   :  { %v165_v45 = vmul.f32 8.0, %v770_v43  ;;  %vm169_vm4 = vweird.f32 %v770_v43 }
   0xe   :  { %v131_v40 = vsub.f32 1.0, %v130_v39 }
   0xf   :  { %v166_v48 = vsub.f32 1.0, %v165_v45 }
  0x10   :  { %v132_v42 = vmul.f32 %v768_v38, %v131_v40 }
  0x11   :  { %v167_v51 = vmul.f32 %v770_v43, %v166_v48 }
  0x12   :  { %v133_v44 = vadd.f32 %v768_v38, %v132_v42 }
  0x13   :  { %v168_v55 = vadd.f32 %v770_v43, %v167_v51 }
  0x14   :  { %v920_v46 = vsel %vm134_vm3, %v768_v38, %v133_v44 }
  0x15   :  { %v924_v60 = vsel %vm169_vm4, %v770_v43, %v168_v55 }
  0x5f   :  { %v46_v13 = vpop.permute.xlu2 %45 }
  0x75   :  { %v31_v7 = vpop.permute.xlu0 %30 }
  0x76   :  { %v34_v9 = vsel %vm33_vm0, %v27_v6, %v31_v7  ;;  %v56_v17 = vpop.permute.xlu1 %55 }
  0x77   :  { %736 = vmatpush.msk.msra.mxu0 %vm76_vm1, %v34_v9 }
  0x78   :  { %737 = vmatmul.msk.f32.vlgmr.msra.gmra.mxu0 %vm63_vm2, %v35_v8 }
  0x7d   :  { %v61_v20 = vpop.permute.xlu0 %60 }
  0x7e   :  { %v51_v23 = vpop.permute.xlu1 %50 }
  0x80   :  { %738 = vmatmul.msk.f32.gmra.mxu0 %vm63_vm2, %v36_v10 }
  0x88   :  { %739 = vmatmul.msk.f32.gmra.mxu0 %vm63_vm2, %v37_v11 }
  0x90   :  { %740 = vmatmul.msk.f32.gmra.mxu0 %vm63_vm2, %v38_v12 }
  0xf5   :  { %v97_v14 = vpop.f32.mrf.mxu0 }
  0xf6   :  { %v892_v15 = vadd.f32 %v97_v14, %v46_v13 }
  0xf8   :  { %335 = vrot.lane.b32.xlu0 %v892_v15, %s813_s26  ;;  %v117_v33 = vsel %vm33_vm0, %v892_v15, 0.0 }
  0xfd   :  { %v100_v16 = vpop.f32.mrf.mxu0 }
  0xfe   :  { %v904_v24 = vadd.f32 %v100_v16, %v51_v23 }
 0x100   :  { %v120_v32 = vsel %vm33_vm0, %v904_v24, 0.0 }
 0x105   :  { %v103_v18 = vpop.f32.mrf.mxu0 }
 0x106   :  { %v896_v19 = vadd.f32 %v103_v18, %v56_v17 }
 0x108   :  { %339 = vrot.lane.b32.xlu1 %v896_v19, %s813_s26  ;;  %v123_v36 = vsel %vm33_vm0, %v896_v19, 0.0 }
 0x10d   :  { %v106_v21 = vpop.f32.mrf.mxu0 }
 0x10e   :  { %v900_v22 = vadd.f32 %v106_v21, %v61_v20 }
 0x110   :  { %341 = vrot.lane.b32.xlu2 %v900_v22, %s813_s26  ;;  %v126_v28 = vsel %vm33_vm0, %v900_v22, 0.0 }
 0x118   :  { %337 = vrot.lane.b32.xlu2 %v904_v24, %s813_s26 }
 0x16a   :  { %v342_v25 = vpop.permute.xlu2 %341  ;;  %v336_v34 = vpop.permute.xlu0 %335 }
 0x16b   :  { %v356_v26 = vsel %vm33_vm0, %v342_v25, 0.0  ;;  %v347_v35 = vsel %vm33_vm0, %v336_v34, 0.0 }
 0x16c   :  { %357 = vadd.xlane.f32.xlu1 %v356_v26 }
 0x172   :  { %v338_v27 = vpop.permute.xlu2 %337 }
 0x173   :  { %v350_v29 = vsel %vm33_vm0, %v338_v27, 0.0 }
 0x174   :  { %127 = vadd.xlane.f32.xlu1 %v126_v28  ;;  %351 = vadd.xlane.f32.xlu0 %v350_v29 }
 0x17a   :  { %v340_v30 = vpop.permute.xlu1 %339 }
 0x17b   :  { %v353_v31 = vsel %vm33_vm0, %v340_v30, 0.0 }
 0x17c   :  { %354 = vadd.xlane.f32.xlu2 %v353_v31  ;;  %121 = vadd.xlane.f32.xlu0 %v120_v32 }
 0x17d   :  { %118 = vadd.xlane.f32.xlu1 %v117_v33 }
 0x184   :  { %348 = vadd.xlane.f32.xlu2 %v347_v35 }
 0x18c   :  { %124 = vadd.xlane.f32.xlu2 %v123_v36 }
 0x1df   :  { %v358_v47 = vpop.xlane.xlu1 %357 }
 0x1e0   :  { %v362_v49 = vmul.f32 %v358_v47, %v920_v46 }
 0x1e2   :  { %v381_v50 = vrot.slane %v362_v49, 4 }
 0x1e4   :  { %v382_v52 = vadd.f32 %v381_v50, %v362_v49 }
 0x1e6   :  { %v383_v53 = vrot.slane %v382_v52, 2 }
 0x1e7   :  { %v352_v54 = vpop.xlane.xlu0 %351  ;;  %v128_v5 = vpop.xlane.xlu1 %127 }
 0x1e8   :  { %v384_v56 = vadd.f32 %v383_v53, %v382_v52  ;;  %v360_v57 = vmul.f32 %v352_v54, %v920_v46  ;;  %v139_v11 = vmul.f32 %v920_v46, %v128_v5 }
 0x1ea   :  { %v385_v58 = vrot.slane %v384_v56, 1  ;;  %v369_v59 = vrot.slane %v360_v57, 4  ;;  %v158_v20 = vrot.slane %v139_v11, 4 }
 0x1ec   :  { %v386_v61 = vadd.f32 %v385_v58, %v384_v56  ;;  %v370_v62 = vadd.f32 %v369_v59, %v360_v57  ;;  %v159_v29 = vadd.f32 %v158_v20, %v139_v11 }
 0x1ee   :  { %v371_v63 = vrot.slane %v370_v62, 2  ;;  %v390_v0 = vmul.f32 %v386_v61, %v924_v60  ;;  %v160_v35 = vrot.slane %v159_v29, 2 }
 0x1ef   :  { %v355_v1 = vpop.xlane.xlu2 %354  ;;  %v122_v23 = vpop.xlane.xlu0 %121 }
 0x1f0   :  { %v372_v2 = vadd.f32 %v371_v63, %v370_v62  ;;  %v361_v3 = vmul.f32 %v355_v1, %v920_v46  ;;  %v929_v4 = vsub.f32 %v900_v22, %v390_v0  ;;  %v137_v30 = vmul.f32 %v920_v46, %v122_v23 }
 0x1f1   :  { %v161_v40 = vadd.f32 %v160_v35, %v159_v29 }
 0x1f2   :  { %v373_v6 = vrot.slane %v372_v2, 1  ;;  %v375_v7 = vrot.slane %v361_v3, 4  ;;  %v398_v8 = vmul.f32 %v929_v4, %v929_v4  ;;  %v146_v36 = vrot.slane %v137_v30, 4 }
 0x1f3   :  { %v162_v44 = vrot.slane %v161_v40, 1 }
 0x1f4   :  { %v374_v9 = vadd.f32 %v373_v6, %v372_v2  ;;  %v376_v10 = vadd.f32 %v375_v7, %v361_v3  ;;  %409 = vrot.lane.b32.xlu2 %v398_v8, %s813_s26  ;;  %v147_v41 = vadd.f32 %v146_v36, %v137_v30 }
 0x1f5   :  { %v163_v49 = vadd.f32 %v162_v44, %v161_v40 }
 0x1f6   :  { %v377_v12 = vrot.slane %v376_v10, 2  ;;  %v388_v13 = vmul.f32 %v374_v9, %v924_v60  ;;  %v148_v45 = vrot.slane %v147_v41, 2 }
 0x1f7   :  { %v349_v14 = vpop.xlane.xlu2 %348  ;;  %v174_v54 = vmul.f32 %v924_v60, %v163_v49 }
 0x1f8   :  { %v378_v16 = vadd.f32 %v377_v12, %v376_v10  ;;  %v359_v17 = vmul.f32 %v349_v14, %v920_v46  ;;  %v938_v18 = vsub.f32 %v904_v24, %v388_v13  ;;  %v149_v50 = vadd.f32 %v148_v45, %v147_v41  ;;  %v119_v10 = vpop.xlane.xlu1 %118 }
 0x1f9   :  { %v961_v57 = vsub.f32 %v900_v22, %v174_v54  ;;  %v136_v11 = vmul.f32 %v920_v46, %v119_v10 }
 0x1fa   :  { %v379_v21 = vrot.slane %v378_v16, 1  ;;  %v363_v25 = vrot.slane %v359_v17, 4  ;;  %v396_v26 = vmul.f32 %v938_v18, %v938_v18  ;;  %v150_v52 = vrot.slane %v149_v50, 1 }
 0x1fb   :  { %v182_v59 = vmul.f32 %v961_v57, %v961_v57  ;;  %v140_v12 = vrot.slane %v136_v11, 4 }
 0x1fc   :  { %v380_v27 = vadd.f32 %v379_v21, %v378_v16  ;;  %v364_v28 = vadd.f32 %v363_v25, %v359_v17  ;;  %405 = vrot.lane.b32.xlu1 %v396_v26, %s813_s26  ;;  %v151_v55 = vadd.f32 %v150_v52, %v149_v50 }
 0x1fd   :  { %v192_v63 = vsel %vm33_vm0, %v182_v59, 0.0  ;;  %v141_v13 = vadd.f32 %v140_v12, %v136_v11 }
 0x1fe   :  { %v365_v31 = vrot.slane %v364_v28, 2  ;;  %v389_v32 = vmul.f32 %v380_v27, %v924_v60  ;;  %v172_v61 = vmul.f32 %v924_v60, %v151_v55 }
 0x1ff   :  { %v125_v47 = vpop.xlane.xlu2 %124  ;;  %v142_v14 = vrot.slane %v141_v13, 2 }
 0x200   :  { %v366_v33 = vadd.f32 %v365_v31, %v364_v28  ;;  %v946_v34 = vsub.f32 %v896_v19, %v389_v32  ;;  %v138_v51 = vmul.f32 %v920_v46, %v125_v47  ;;  %v968_v0 = vsub.f32 %v904_v24, %v172_v61 }
 0x201   :  { %v143_v16 = vadd.f32 %v142_v14, %v141_v13 }
 0x202   :  { %v367_v37 = vrot.slane %v366_v33, 1  ;;  %v397_v38 = vmul.f32 %v946_v34, %v946_v34  ;;  %v152_v53 = vrot.slane %v138_v51, 4  ;;  %v180_v2 = vmul.f32 %v968_v0, %v968_v0 }
 0x203   :  { %v144_v17 = vrot.slane %v143_v16, 1 }
 0x204   :  { %v368_v39 = vadd.f32 %v367_v37, %v366_v33  ;;  %407 = vrot.lane.b32.xlu0 %v397_v38, %s813_s26  ;;  %v153_v56 = vadd.f32 %v152_v53, %v138_v51  ;;  %v186_v22 = vsel %vm33_vm0, %v180_v2, 0.0 }
 0x205   :  { %v145_v20 = vadd.f32 %v144_v17, %v143_v16 }
 0x206   :  { %v387_v42 = vmul.f32 %v368_v39, %v924_v60  ;;  %v154_v58 = vrot.slane %v153_v56, 2 }
 0x207   :  { %v171_v23 = vmul.f32 %v924_v60, %v145_v20 }
 0x208   :  { %v953_v43 = vsub.f32 %v892_v15, %v387_v42  ;;  %v155_v62 = vadd.f32 %v154_v58, %v153_v56 }
 0x209   :  { %v986_v27 = vsub.f32 %v892_v15, %v171_v23 }
 0x20a   :  { %v395_v48 = vmul.f32 %v953_v43, %v953_v43  ;;  %v156_v1 = vrot.slane %v155_v62, 1 }
 0x20b   :  { %v179_v28 = vmul.f32 %v986_v27, %v986_v27 }
 0x20c   :  { %403 = vrot.lane.b32.xlu0 %v395_v48, %s813_s26  ;;  %v157_v3 = vadd.f32 %v156_v1, %v155_v62 }
 0x20d   :  { %v183_v31 = vsel %vm33_vm0, %v179_v28, 0.0 }
 0x20e   :  { %v173_v5 = vmul.f32 %v924_v60, %v157_v3 }
 0x210   :  { %v975_v6 = vsub.f32 %v896_v19, %v173_v5 }
 0x212   :  { %v181_v7 = vmul.f32 %v975_v6, %v975_v6 }
 0x214   :  { %v189_v24 = vsel %vm33_vm0, %v181_v7, 0.0  ;;  %v1000_v7 = vld [vmem:[%s1147_s3 + $0x18] sm:$0xff] }
 0x21d   :  { %193 = vadd.xlane.f32.xlu2 %v192_v63 }
 0x226   :  { %187 = vadd.xlane.f32.xlu1 %v186_v22 }
 0x236   :  { %190 = vadd.xlane.f32.xlu0 %v189_v24 }
 0x24e   :  { %v410_v8 = vpop.permute.xlu2 %409 }
 0x24f   :  { %v424_v9 = vsel %vm33_vm0, %v410_v8, 0.0 }
 0x250   :  { %425 = vadd.xlane.f32.xlu1 %v424_v9 }
 0x26e   :  { %v406_v19 = vpop.permute.xlu1 %405 }
 0x26f   :  { %v418_v21 = vsel %vm33_vm0, %v406_v19, 0.0  ;;  %v116_v19 = vld [vmem:[%s1148_s4 + $0x18] sm:$0xff] }
 0x270   :  { %419 = vadd.xlane.f32.xlu0 %v418_v21 }
 0x276   :  { %v408_v25 = vpop.permute.xlu0 %407 }
 0x277   :  { %v421_v26 = vsel %vm33_vm0, %v408_v25, 0.0  ;;  %v1010_v25 = vld [vmem:[%s1147_s3 + $0x8] sm:$0xff] }
 0x278   :  { %422 = vadd.xlane.f32.xlu2 %v421_v26 }
 0x27e   :  { %v404_v29 = vpop.permute.xlu0 %403 }
 0x27f   :  { %v415_v30 = vsel %vm33_vm0, %v404_v29, 0.0 }
 0x280   :  { %416 = vadd.xlane.f32.xlu1 %v415_v30  ;;  %184 = vadd.xlane.f32.xlu2 %v183_v31 }
 0x290   :  { %v194_v32 = vpop.xlane.xlu2 %193 }
 0x291   :  { %v198_v33 = vmul.f32 %v194_v32, %v920_v46  ;;  %v1016_v32 = vld [vmem:[%s1147_s3 + $0x10] sm:$0xff] }
 0x293   :  { %v217_v35 = vrot.slane %v198_v33, 4 }
 0x295   :  { %v218_v36 = vadd.f32 %v217_v35, %v198_v33 }
 0x297   :  { %v219_v37 = vrot.slane %v218_v36, 2 }
 0x299   :  { %v188_v38 = vpop.xlane.xlu1 %187  ;;  %v220_v15 = vadd.f32 %v219_v37, %v218_v36 }
 0x29a   :  { %v196_v39 = vmul.f32 %v188_v38, %v920_v46 }
 0x29b   :  { %v221_v40 = vrot.slane %v220_v15, 1 }
 0x29c   :  { %v205_v41 = vrot.slane %v196_v39, 4 }
 0x29d   :  { %v222_v42 = vadd.f32 %v221_v40, %v220_v15  ;;  %v115_v15 = vld [vmem:[%s1148_s4 + $0x10] sm:$0xff] }
 0x29e   :  { %v206_v44 = vadd.f32 %v205_v41, %v196_v39  ;;  %v114_v41 = vld [vmem:[%s1148_s4 + $0x8] sm:$0xff] }
 0x29f   :  { %v226_v45 = vmul.f32 %v222_v42, %v924_v60 }
 0x2a0   :  { %v207_v47 = vrot.slane %v206_v44, 2 }
 0x2a1   :  { %v230_v48 = vadd.f32 1e-05, %v226_v45 }
 0x2a2   :  { %v208_v49 = vadd.f32 %v207_v47, %v206_v44 }
 0x2a3   :  { %771 = vrsqrt.f32 %v230_v48  ;;  %vm267_vm6 = vweird.f32 %v230_v48 }
 0x2a4   :  { %v209_v50 = vrot.slane %v208_v49, 1 }
 0x2a6   :  { %v210_v51 = vadd.f32 %v209_v50, %v208_v49 }
 0x2a8   :  { %v224_v52 = vmul.f32 %v210_v51, %v924_v60 }
 0x2a9   :  { %v191_v53 = vpop.xlane.xlu0 %190  ;;  %v772_v54 = vpop.eup %771 }
 0x2aa   :  { %v228_v55 = vadd.f32 1e-05, %v224_v52  ;;  %v197_v56 = vmul.f32 %v191_v53, %v920_v46  ;;  %v262_v58 = vmul.f32 %v772_v54, %v230_v48  ;;  %vm268_vm5 = vweird.f32 %v772_v54  ;;  %v555_v48 = vld [vmem:[%s1150_s6] sm:$0xff] }
 0x2ab   :  { %vm269_vm7 = vmor %vm267_vm6, %vm268_vm5 }
 0x2ac   :  { %773 = vrsqrt.f32 %v228_v55  ;;  %v211_v59 = vrot.slane %v197_v56, 4  ;;  %v263_v61 = vmul.f32 %v772_v54, %v262_v58  ;;  %vm247_vm9 = vweird.f32 %v228_v55  ;;  %v558_v58 = vld [vmem:[%s1150_s6 + $0x18] sm:$0xff] }
 0x2ae   :  { %v212_v62 = vadd.f32 %v211_v59, %v197_v56  ;;  %v264_v63 = vmul.f32 0.5, %v263_v61 }
 0x2b0   :  { %v213_v1 = vrot.slane %v212_v62, 2  ;;  %v265_v2 = vsub.f32 1.5, %v264_v63 }
 0x2b2   :  { %v774_v3 = vpop.eup %773  ;;  %v214_v22 = vadd.f32 %v213_v1, %v212_v62  ;;  %v266_v24 = vmul.f32 %v772_v54, %v265_v2 }
 0x2b3   :  { %v242_v5 = vmul.f32 %v774_v3, %v228_v55  ;;  %vm248_vm8 = vweird.f32 %v774_v3 }
 0x2b4   :  { %v215_v8 = vrot.slane %v214_v22, 1  ;;  %v270_v9 = vsel %vm269_vm7, %v772_v54, %v266_v24  ;;  %vm249_vm10 = vmor %vm247_vm9, %vm248_vm8 }
 0x2b5   :  { %v243_v10 = vmul.f32 %v774_v3, %v242_v5  ;;  %v274_v12 = vmul.f32 %v270_v9, %v1000_v7 }
 0x2b6   :  { %v216_v11 = vadd.f32 %v215_v8, %v214_v22 }
 0x2b7   :  { %v244_v13 = vmul.f32 0.5, %v243_v10  ;;  %292 = vperm.xlu0 %764, %v274_v12   ;;  %v561_v12 = vld [vmem:[%s1150_s6 + $0x30] sm:$0xff] }
 0x2b8   :  { %v225_v14 = vmul.f32 %v216_v11, %v924_v60 }
 0x2b9   :  { %v245_v17 = vsub.f32 1.5, %v244_v13 }
 0x2ba   :  { %v229_v16 = vadd.f32 1e-05, %v225_v14 }
 0x2bb   :  { %v246_v20 = vmul.f32 %v774_v3, %v245_v17 }
 0x2bc   :  { %775 = vrsqrt.f32 %v229_v16  ;;  %vm257_vm12 = vweird.f32 %v229_v16 }
 0x2bd   :  { %v250_v26 = vsel %vm249_vm10, %v774_v3, %v246_v20 }
 0x2be   :  { %v272_v29 = vmul.f32 %v250_v26, %v1010_v25 }
 0x2bf   :  { %316 = vperm.xlu0 %764, %v116_v19  }
 0x2c2   :  { %v776_v21 = vpop.eup %775 }
 0x2c3   :  { %v252_v23 = vmul.f32 %v776_v21, %v229_v16  ;;  %vm258_vm11 = vweird.f32 %v776_v21  ;;  %v426_v37 = vpop.xlane.xlu1 %425 }
 0x2c4   :  { %vm259_vm13 = vmor %vm257_vm12, %vm258_vm11  ;;  %v430_v38 = vmul.f32 %v426_v37, %v920_v46 }
 0x2c5   :  { %v253_v28 = vmul.f32 %v776_v21, %v252_v23 }
 0x2c6   :  { %v449_v39 = vrot.slane %v430_v38, 4 }
 0x2c7   :  { %v254_v30 = vmul.f32 0.5, %v253_v28  ;;  %282 = vperm.xlu0 %764, %v272_v29  }
 0x2c8   :  { %v450_v40 = vadd.f32 %v449_v39, %v430_v38 }
 0x2c9   :  { %v255_v31 = vsub.f32 1.5, %v254_v30 }
 0x2ca   :  { %v451_v42 = vrot.slane %v450_v40, 2 }
 0x2cb   :  { %v256_v33 = vmul.f32 %v776_v21, %v255_v31 }
 0x2cc   :  { %v452_v44 = vadd.f32 %v451_v42, %v450_v40 }
 0x2cd   :  { %v260_v35 = vsel %vm259_vm13, %v776_v21, %v256_v33 }
 0x2ce   :  { %v273_v36 = vmul.f32 %v260_v35, %v1016_v32  ;;  %v453_v50 = vrot.slane %v452_v44, 1 }
 0x2d0   :  { %287 = vperm.xlu1 %765, %v273_v36   ;;  %v454_v53 = vadd.f32 %v453_v50, %v452_v44 }
 0x2d2   :  { %v458_v62 = vmul.f32 %v454_v53, %v924_v60 }
 0x2d4   :  { %v1036_v22 = vadd.f32 1e-05, %v458_v62 }
 0x2d6   :  { %vm499_vm7 = vweird.f32 %v1036_v22 }
 0x2d8   :  { %311 = vperm.xlu1 %765, %v115_v15  }
 0x2e0   :  { %306 = vperm.xlu1 %765, %v114_v41  }
 0x2e3   :  { %v420_v45 = vpop.xlane.xlu0 %419 }
 0x2e4   :  { %v428_v47 = vmul.f32 %v420_v45, %v920_v46 }
 0x2e6   :  { %v437_v49 = vrot.slane %v428_v47, 4 }
 0x2e8   :  { %v438_v51 = vadd.f32 %v437_v49, %v428_v47  ;;  %565 = vperm.xlu1 %765, %v555_v48  }
 0x2ea   :  { %v439_v52 = vrot.slane %v438_v51, 2 }
 0x2eb   :  { %v423_v54 = vpop.xlane.xlu2 %422 }
 0x2ec   :  { %v440_v55 = vadd.f32 %v439_v52, %v438_v51  ;;  %v429_v56 = vmul.f32 %v423_v54, %v920_v46 }
 0x2ee   :  { %v441_v59 = vrot.slane %v440_v55, 1  ;;  %v443_v61 = vrot.slane %v429_v56, 4 }
 0x2f0   :  { %v442_v63 = vadd.f32 %v441_v59, %v440_v55  ;;  %v444_v1 = vadd.f32 %v443_v61, %v429_v56  ;;  %580 = vperm.xlu1 %765, %v558_v58  }
 0x2f2   :  { %v456_v2 = vmul.f32 %v442_v63, %v924_v60  ;;  %v445_v3 = vrot.slane %v444_v1, 2 }
 0x2f3   :  { %v185_v5 = vpop.xlane.xlu2 %184  ;;  %v417_v24 = vpop.xlane.xlu1 %416 }
 0x2f4   :  { %v460_v8 = vadd.f32 1e-05, %v456_v2  ;;  %v446_v9 = vadd.f32 %v445_v3, %v444_v1  ;;  %v195_v10 = vmul.f32 %v185_v5, %v920_v46  ;;  %v427_v11 = vmul.f32 %v417_v24, %v920_v46 }
 0x2f6   :  { %777 = vrsqrt.f32 %v460_v8  ;;  %v447_v13 = vrot.slane %v446_v9, 1  ;;  %v199_v14 = vrot.slane %v195_v10, 4  ;;  %v431_v16 = vrot.slane %v427_v11, 4 }
 0x2f7   :  { %779 = vrsqrt.f32 %v1036_v22  ;;  %vm479_vm15 = vweird.f32 %v460_v8 }
 0x2f8   :  { %v448_v17 = vadd.f32 %v447_v13, %v446_v9  ;;  %v200_v19 = vadd.f32 %v199_v14, %v195_v10  ;;  %v432_v20 = vadd.f32 %v431_v16, %v427_v11  ;;  %595 = vperm.xlu1 %765, %v561_v12   ;;  %v109_v11 = vld [vmem:[%s1147_s3] sm:$0xff]  ;;  %s724_s3 = sshll.u32 %s1151_s7, 4  ;;  %s725_s3 = int_to_ptr.hbm [resolvable:$true] %s724_s3 }
 0x2fa   :  { %v457_v21 = vmul.f32 %v448_v17, %v924_v60  ;;  %v201_v23 = vrot.slane %v200_v19, 2  ;;  %v433_v26 = vrot.slane %v432_v20, 2 }
 0x2fc   :  { %v778_v28 = vpop.eup %777  ;;  %v461_v46 = vadd.f32 1e-05, %v457_v21  ;;  %v202_v29 = vadd.f32 %v201_v23, %v200_v19  ;;  %v434_v30 = vadd.f32 %v433_v26, %v432_v20  ;;  %v113_v20 = vld [vmem:[%s1148_s4] sm:$0xff]  ;;  %v557_v23 = vld [vmem:[%s1150_s6 + $0x10] sm:$0xff]  ;;  %v560_v26 = vld [vmem:[%s1150_s6 + $0x28] sm:$0xff] }
 0x2fd   :  { %v474_v31 = vmul.f32 %v778_v28, %v460_v8  ;;  %v780_v33 = vpop.eup %779  ;;  %vm480_vm14 = vweird.f32 %v778_v28 }
 0x2fe   :  { %781 = vrsqrt.f32 %v461_v46  ;;  %v203_v35 = vrot.slane %v202_v29, 1  ;;  %v435_v36 = vrot.slane %v434_v30, 1  ;;  %v494_v39 = vmul.f32 %v780_v33, %v1036_v22  ;;  %vm481_vm1 = vmor %vm479_vm15, %vm480_vm14 }
 0x2ff   :  { %v475_v37 = vmul.f32 %v778_v28, %v474_v31  ;;  %vm489_vm3 = vweird.f32 %v461_v46  ;;  %vm500_vm5 = vweird.f32 %v780_v33  ;;  %vm603_vm14 = vcmask 261120  }
 0x300   :  { %v204_v38 = vadd.f32 %v203_v35, %v202_v29  ;;  %v436_v15 = vadd.f32 %v435_v36, %v434_v30  ;;  %v495_v51 = vmul.f32 %v780_v33, %v494_v39  ;;  %vm501_vm8 = vmor %vm499_vm7, %vm500_vm5 }
 0x301   :  { %v476_v40 = vmul.f32 0.5, %v475_v37 }
 0x302   :  { %v223_v41 = vmul.f32 %v204_v38, %v924_v60  ;;  %v455_v42 = vmul.f32 %v436_v15, %v924_v60  ;;  %v496_v56 = vmul.f32 0.5, %v495_v51 }
 0x303   :  { %v477_v44 = vsub.f32 1.5, %v476_v40 }
 0x304   :  { %v782_v45 = vpop.eup %781  ;;  %v227_v47 = vadd.f32 1e-05, %v223_v41  ;;  %v459_v48 = vadd.f32 1e-05, %v455_v42  ;;  %v497_v63 = vsub.f32 1.5, %v496_v56 }
 0x305   :  { %v484_v49 = vmul.f32 %v782_v45, %v461_v46  ;;  %v478_v50 = vmul.f32 %v778_v28, %v477_v44  ;;  %vm490_vm2 = vweird.f32 %v782_v45  ;;  %v562_v46 = vld [vmem:[%s1150_s6 + $0x38] sm:$0xff] }
 0x306   :  { %783 = vrsqrt.f32 %v227_v47  ;;  %vm491_vm4 = vmor %vm489_vm3, %vm490_vm2  ;;  %vm237_vm9 = vweird.f32 %v227_v47  ;;  %vm469_vm12 = vweird.f32 %v459_v48 }
 0x307   :  { %785 = vrsqrt.f32 %v459_v48  ;;  %v482_v52 = vsel %vm481_vm1, %v778_v28, %v478_v50  ;;  %v485_v53 = vmul.f32 %v782_v45, %v484_v49  ;;  %v559_v28 = vld [vmem:[%s1150_s6 + $0x20] sm:$0xff] }
 0x308   :  { %v504_v54 = vmul.f32 %v482_v52, %v1010_v25  ;;  %v498_v25 = vmul.f32 %v780_v33, %v497_v63 }
 0x309   :  { %v486_v55 = vmul.f32 0.5, %v485_v53 }
 0x30a   :  { %514 = vperm.xlu2 %766, %v504_v54   ;;  %v502_v13 = vsel %vm501_vm8, %v780_v33, %v498_v25 }
 0x30b   :  { %v487_v60 = vsub.f32 1.5, %v486_v55  ;;  %v506_v17 = vmul.f32 %v502_v13, %v1000_v7  ;;  %v556_v7 = vld [vmem:[%s1150_s6 + $0x8] sm:$0xff] }
 0x30c   :  { %v784_v58 = vpop.eup %783 }
 0x30d   :  { %v786_v59 = vpop.eup %785  ;;  %v232_v61 = vmul.f32 %v784_v58, %v227_v47  ;;  %v488_v62 = vmul.f32 %v782_v45, %v487_v60  ;;  %vm238_vm6 = vweird.f32 %v784_v58 }
 0x30e   :  { %v464_v1 = vmul.f32 %v786_v59, %v459_v48  ;;  %vm239_vm10 = vmor %vm237_vm9, %vm238_vm6  ;;  %vm470_vm11 = vweird.f32 %v786_v59 }
 0x30f   :  { %v492_v2 = vsel %vm491_vm4, %v782_v45, %v488_v62  ;;  %v233_v3 = vmul.f32 %v784_v58, %v232_v61  ;;  %vm471_vm13 = vmor %vm469_vm12, %vm470_vm11 }
 0x310   :  { %v505_v5 = vmul.f32 %v492_v2, %v1016_v32  ;;  %v465_v24 = vmul.f32 %v786_v59, %v464_v1 }
 0x311   :  { %v234_v8 = vmul.f32 0.5, %v233_v3 }
 0x312   :  { %519 = vperm.xlu2 %766, %v505_v5   ;;  %v466_v9 = vmul.f32 0.5, %v465_v24 }
 0x313   :  { %v235_v10 = vsub.f32 1.5, %v234_v8 }
 0x314   :  { %v467_v14 = vsub.f32 1.5, %v466_v9 }
 0x315   :  { %v236_v12 = vmul.f32 %v784_v58, %v235_v10 }
 0x316   :  { %v468_v19 = vmul.f32 %v786_v59, %v467_v14  ;;  %v548_v14 = vld [vmem:[%s1149_s5 + $0x8] sm:$0xff] }
 0x317   :  { %v240_v32 = vsel %vm239_vm10, %v784_v58, %v236_v12  ;;  %v547_v12 = vld [vmem:[%s1149_s5] sm:$0xff] }
 0x318   :  { %v271_v16 = vmul.f32 %v240_v32, %v109_v11  ;;  %v472_v22 = vsel %vm471_vm13, %v786_v59, %v468_v19  ;;  %v551_v32 = vld [vmem:[%s1149_s5 + $0x20] sm:$0xff]  ;;  %v552_v19 = vld [vmem:[%s1149_s5 + $0x28] sm:$0xff] }
 0x319   :  { %v503_v21 = vmul.f32 %v472_v22, %v109_v11 }
 0x31a   :  { %277 = vperm.xlu0 %764, %v271_v16   ;;  %524 = vperm.xlu2 %766, %v506_v17   ;;  %v554_v16 = vld [vmem:[%s1149_s5 + $0x38] sm:$0xff]  ;;  %v549_v17 = vld [vmem:[%s1149_s5 + $0x10] sm:$0xff] }
 0x322   :  { %301 = vperm.xlu0 %764, %v113_v20   ;;  %509 = vperm.xlu2 %766, %v503_v21  }
 0x329   :  { %v293_v29 = vpop.permute.xlu0 %292 }
 0x32a   :  { %575 = vperm.xlu0 %764, %v557_v23   ;;  %570 = vperm.xlu2 %766, %v556_v7   ;;  %v298_v38 = vmul.f32 %v293_v29, %v961_v57 }
 0x331   :  { %v317_v33 = vpop.permute.xlu0 %316 }
 0x332   :  { %590 = vperm.xlu0 %764, %v560_v26   ;;  %585 = vperm.xlu2 %766, %v559_v28   ;;  %v322_v40 = vadd.f32 %v317_v33, %v298_v38 }
 0x334   :  { %v326_v51 = vmul.f32 0.2, %v322_v40 }
 0x336   :  { %v330_v55 = vmax.f32 %v322_v40, %v326_v51 }
 0x339   :  { %v283_v39 = vpop.permute.xlu0 %282 }
 0x33a   :  { %600 = vperm.xlu2 %766, %v562_v46   ;;  %v296_v47 = vmul.f32 %v283_v39, %v968_v0 }
 0x342   :  { %v288_v30 = vpop.permute.xlu1 %287 }
 0x343   :  { %v297_v41 = vmul.f32 %v288_v30, %v975_v6 }
 0x34a   :  { %v312_v35 = vpop.permute.xlu1 %311 }
 0x34b   :  { %v321_v48 = vadd.f32 %v312_v35, %v297_v41 }
 0x34d   :  { %v325_v57 = vmul.f32 0.2, %v321_v48 }
 0x34f   :  { %v329_v58 = vmax.f32 %v321_v48, %v325_v57 }
 0x352   :  { %v307_v44 = vpop.permute.xlu1 %306 }
 0x353   :  { %v320_v52 = vadd.f32 %v307_v44, %v296_v47 }
 0x355   :  { %v324_v56 = vmul.f32 0.2, %v320_v52 }
 0x357   :  { %v328_v0 = vmax.f32 %v320_v52, %v324_v56 }
 0x35a   :  { %v566_v22 = vpop.permute.xlu1 %565 }
 0x362   :  { %v581_v21 = vpop.permute.xlu1 %580 }
 0x364   :  { %v515_v31 = vpop.permute.xlu2 %514 }
 0x365   :  { %v528_v15 = vmul.f32 %v515_v31, %v938_v18 }
 0x367   :  { %v532_v49 = vadd.f32 %v528_v15, %v307_v44 }
 0x369   :  { %v536_v54 = vmul.f32 0.2, %v532_v49 }
 0x36a   :  { %v596_v28 = vpop.permute.xlu1 %595 }
 0x36b   :  { %v540_v59 = vmax.f32 %v532_v49, %v536_v54 }
 0x36c   :  { %v520_v36 = vpop.permute.xlu2 %519 }
 0x36d   :  { %v529_v37 = vmul.f32 %v520_v36, %v946_v34  ;;  %v544_v62 = vsel %vm33_vm0, %v328_v0, %v540_v59 }
 0x36f   :  { %v533_v42 = vadd.f32 %v529_v37, %v312_v35 }
 0x371   :  { %v537_v34 = vmul.f32 0.2, %v533_v42 }
 0x373   :  { %v541_v60 = vmax.f32 %v533_v42, %v537_v34 }
 0x374   :  { %v525_v45 = vpop.permute.xlu2 %524 }
 0x375   :  { %v530_v50 = vmul.f32 %v525_v45, %v929_v4  ;;  %v545_v4 = vsel %vm33_vm0, %v329_v58, %v541_v60 }
 0x377   :  { %v534_v53 = vadd.f32 %v530_v50, %v317_v33 }
 0x379   :  { %v538_v18 = vmul.f32 0.2, %v534_v53 }
 0x37b   :  { %v542_v6 = vmax.f32 %v534_v53, %v538_v18 }
 0x37c   :  { %v510_v1 = vpop.permute.xlu2 %509 }
 0x37d   :  { %v546_v61 = vsel %vm33_vm0, %v330_v55, %v542_v6  ;;  %v527_v2 = vmul.f32 %v510_v1, %v953_v43  ;;  %v550_v43 = vld [vmem:[%s1149_s5 + $0x18] sm:$0xff] }
 0x37e   :  { %640 = vmatpush.msra.mxu1 %v546_v61  ;;  %749 = vmatpush.msra.mxu2 %v546_v61 }
 0x37f   :  { %750 = vmatpush.msra.mxu3 %v546_v61 }
 0x380   :  { %641 = vmatpush.msra.mxu1 %v545_v4  ;;  %751 = vmatpush.msra.mxu2 %v545_v4 }
 0x381   :  { %752 = vmatpush.msra.mxu3 %v545_v4 }
 0x382   :  { %642 = vmatpush.msra.mxu1 %v544_v62  ;;  %753 = vmatpush.msra.mxu2 %v544_v62 }
 0x383   :  { %754 = vmatpush.msra.mxu3 %v544_v62 }
 0x384   :  { %v571_v20 = vpop.permute.xlu2 %570 }
 0x38c   :  { %v278_v63 = vpop.permute.xlu0 %277  ;;  %v586_v26 = vpop.permute.xlu2 %585 }
 0x38d   :  { %v295_v3 = vmul.f32 %v278_v63, %v986_v27  ;;  %v553_v27 = vld [vmem:[%s1149_s5 + $0x30] sm:$0xff]  ;;  %s817_s5 = smov [#allocation2]  }
 0x394   :  { %v302_v5 = vpop.permute.xlu0 %301  ;;  %v601_v37 = vpop.permute.xlu2 %600 }
 0x395   :  { %v319_v24 = vadd.f32 %v302_v5, %v295_v3  ;;  %v531_v8 = vadd.f32 %v527_v2, %v302_v5 }
 0x397   :  { %v323_v25 = vmul.f32 0.2, %v319_v24  ;;  %v535_v9 = vmul.f32 0.2, %v531_v8 }
 0x399   :  { %v327_v10 = vmax.f32 %v319_v24, %v323_v25  ;;  %v539_v11 = vmax.f32 %v531_v8, %v535_v9 }
 0x39b   :  { %v543_v13 = vsel %vm33_vm0, %v327_v10, %v539_v11 }
 0x39c   :  { %643 = vmatpush.msra.mxu1 %v543_v13  ;;  %755 = vmatpush.msra.mxu2 %v543_v13  ;;  %v576_v36 = vpop.permute.xlu0 %575 }
 0x39d   :  { %756 = vmatpush.msra.mxu3 %v543_v13  ;;  %741 = vmatmul.msk.f32.vlgmr.msra.gmra.mxu1 %vm603_vm14, %v547_v12 }
 0x39e   :  { %744 = vmatmul.msk.f32.vlgmr.msra.gmra.mxu2 %vm603_vm14, %v550_v43  ;;  %747 = vmatmul.msk.f32.vlgmr.msra.gmra.mxu3 %vm603_vm14, %v553_v27 }
 0x3a4   :  { %v591_v44 = vpop.permute.xlu0 %590 }
 0x3a5   :  { %742 = vmatmul.msk.f32.gmra.mxu1 %vm603_vm14, %v548_v14 }
 0x3a6   :  { %745 = vmatmul.msk.f32.gmra.mxu2 %vm603_vm14, %v551_v32  ;;  %748 = vmatmul.msk.f32.gmra.mxu3 %vm603_vm14, %v554_v16 }
 0x3ad   :  { %743 = vmatmul.msk.f32.gmra.mxu1 %vm603_vm14, %v549_v17 }
 0x3ae   :  { %746 = vmatmul.msk.f32.gmra.mxu2 %vm603_vm14, %v552_v19 }
 0x41a   :  { %v645_v23 = vpop.f32.mrf.mxu1 }
 0x41b   :  { %v646_v7 = vadd.f32 %v645_v23, %v566_v22 }
 0x41d   :  { %669 = vst.msk [vmem:[#allocation2] sm:$0xff] %vm33_vm0, %v646_v7  ;;  %685 = vrot.lane.b32.xlu0 %v646_v7, %s813_s26 }
 0x421   :  { %v654_v46 = vpop.f32.mrf.mxu2  ;;  %v663_v29 = vpop.f32.mrf.mxu3 }
 0x422   :  { %v655_v30 = vadd.f32 %v654_v46, %v581_v21  ;;  %v664_v31 = vadd.f32 %v663_v29, %v596_v28  ;;  %v648_v33 = vpop.f32.mrf.mxu1 }
 0x423   :  { %v649_v35 = vadd.f32 %v648_v33, %v571_v20 }
 0x424   :  { %672 = vst.msk [vmem:[#allocation2 + $0x18] sm:$0xff] %vm33_vm0, %v655_v30 }
 0x425   :  { %675 = vst.msk [vmem:[#allocation2 + $0x30] sm:$0xff] %vm33_vm0, %v664_v31  ;;  %687 = vrot.lane.b32.xlu1 %v649_v35, %s813_s26  ;;  %691 = vrot.lane.b32.xlu0 %v655_v30, %s813_s26 }
 0x426   :  { %670 = vst.msk [vmem:[#allocation2 + $0x8] sm:$0xff] %vm33_vm0, %v649_v35 }
 0x429   :  { %v657_v38 = vpop.f32.mrf.mxu2  ;;  %v666_v15 = vpop.f32.mrf.mxu3 }
 0x42a   :  { %v658_v39 = vadd.f32 %v657_v38, %v586_v26  ;;  %v667_v40 = vadd.f32 %v666_v15, %v601_v37  ;;  %v651_v41 = vpop.f32.mrf.mxu1 }
 0x42b   :  { %v652_v42 = vadd.f32 %v651_v41, %v576_v36 }
 0x42c   :  { %673 = vst.msk [vmem:[#allocation2 + $0x20] sm:$0xff] %vm33_vm0, %v658_v39 }
 0x42d   :  { %676 = vst.msk [vmem:[#allocation2 + $0x38] sm:$0xff] %vm33_vm0, %v667_v40  ;;  %689 = vrot.lane.b32.xlu2 %v652_v42, %s813_s26  ;;  %693 = vrot.lane.b32.xlu1 %v658_v39, %s813_s26 }
 0x42e   :  { %671 = vst.msk [vmem:[#allocation2 + $0x10] sm:$0xff] %vm33_vm0, %v652_v42  ;;  %697 = vrot.lane.b32.xlu0 %v664_v31, %s813_s26 }
 0x431   :  { %v660_v45 = vpop.f32.mrf.mxu2 }
 0x432   :  { %v661_v47 = vadd.f32 %v660_v45, %v591_v44 }
 0x434   :  { %674 = vst.msk [vmem:[#allocation2 + $0x28] sm:$0xff] %vm33_vm0, %v661_v47 }
 0x435   :  { %695 = vrot.lane.b32.xlu2 %v661_v47, %s813_s26  ;;  %699 = vrot.lane.b32.xlu1 %v667_v40, %s813_s26  ;;  %s722_s26 = sshll.u32 %s817_s5, 4  ;;  %s723_s26 = int_to_ptr.vmem [resolvable:$true] %s722_s26 }
 0x487   :  { %v690_v48 = vpop.permute.xlu2 %689 }
 0x488   :  { %712 = vst.msk [vmem:[#allocation2 + $0x50] sm:$0xff] %vm33_vm0, %v690_v48 }
 0x48f   :  { %v696_v49 = vpop.permute.xlu2 %695  ;;  %v686_v50 = vpop.permute.xlu0 %685 }
 0x490   :  { %715 = vst.msk [vmem:[#allocation2 + $0x68] sm:$0xff] %vm33_vm0, %v696_v49 }
 0x491   :  { %710 = vst.msk [vmem:[#allocation2 + $0x40] sm:$0xff] %vm33_vm0, %v686_v50 }
 0x497   :  { %v692_v51 = vpop.permute.xlu0 %691  ;;  %v688_v52 = vpop.permute.xlu1 %687 }
 0x498   :  { %713 = vst.msk [vmem:[#allocation2 + $0x58] sm:$0xff] %vm33_vm0, %v692_v51 }
 0x499   :  { %711 = vst.msk [vmem:[#allocation2 + $0x48] sm:$0xff] %vm33_vm0, %v688_v52 }
 0x49f   :  { %v694_v34 = vpop.permute.xlu1 %693 }
 0x4a0   :  { %v698_v53 = vpop.permute.xlu0 %697  ;;  %714 = vst.msk [vmem:[#allocation2 + $0x60] sm:$0xff] %vm33_vm0, %v694_v34 }
 0x4a1   :  { %716 = vst.msk [vmem:[#allocation2 + $0x70] sm:$0xff] %vm33_vm0, %v698_v53 }
 0x4a7   :  { %v700_v57 = vpop.permute.xlu1 %699 }
 0x4a8   :  { %717 = vst.msk [vmem:[#allocation2 + $0x78] sm:$0xff] %vm33_vm0, %v700_v57 }
 0x4a9   :  { %730 = dma.vmem_to_hbm [thread:$0]  %s723_s26, 2048, %s725_s3, [#allocation3], %s818_s18, %s818_s18, %s819_s0  }
 0x4aa   :  { %811 = dma.done.wait [#allocation3], 2048  }
 0x4ab   :  { %812 = vsyncadd [#allocation3], 4294965248 }
 0x4ac   :  { %735 = vsyncpa [#allocation3], 1 }

</bundles_post_ra>
